<compile_context>
chip_gen: v5e
topology: v5e:2x2
jax: 0.10.0
libtpu: 0.0.40
codegen_flags: <defaults>
</compile_context>

<pallas_src>
import functools

import jax
import jax.numpy as jnp
from jax import lax
from jax.experimental import pallas as pl
from jax.experimental.pallas import tpu as pltpu


# 40 MiB scoped VMEM: raises the default on v5e/v6e, leaves headroom on v7x.
_VMEM_LIMIT = 40 * 1024 * 1024


def _pick_tile(n, candidates):
    """Largest candidate that divides n (n is pre-padded to a multiple of 8)."""
    for c in candidates:
        if n >= c and n % c == 0:
            return c
    return n


def _row_tile(n_rows, feat):
    """Row tile for the projections: as large as possible (cuts weight
    re-reads in the HBM-bound regime) but bounded so the K-untiled (tm, C)
    x tile + f32 (tm, C) accumulator stay well inside the VMEM budget."""
    budget = 12 * 1024 * 1024
    for t in (1024, 512, 256, 128, 64, 32, 16, 8):
        if t <= n_rows and n_rows % t == 0 and 3 * t * feat * 4 <= budget:
            return t
    return 8 if n_rows % 8 == 0 else n_rows


def _padded_len(n):
    if n >= 128:
        return ((n + 127) // 128) * 128
    return ((n + 7) // 8) * 8


# ---------------------------------------------------------------------------
# 1) Fused QKV projection + head split.
# ---------------------------------------------------------------------------
def _qkv_kernel(x_ref, wq_ref, wk_ref, wv_ref, q_ref, k_ref, v_ref):
    x = x_ref[0]                                     # (tm, C)
    dims = (((1,), (1,)), ((), ()))                  # torch (out, in) layout: contract last dims
    q_ref[0, 0] = lax.dot_general(
        x, wq_ref[...], dims, preferred_element_type=jnp.float32).astype(q_ref.dtype)
    k_ref[0, 0] = lax.dot_general(
        x, wk_ref[...], dims, preferred_element_type=jnp.float32).astype(k_ref.dtype)
    v_ref[0, 0] = lax.dot_general(
        x, wv_ref[...], dims, preferred_element_type=jnp.float32).astype(v_ref.dtype)


def _qkv_project(x, w_qkv, *, num_heads):
    """x: (B, Np, C); w_qkv: (3C, C) torch (out,in). Returns q, k, v: (B, H, Np, d)."""
    B, Np, C = x.shape
    H = num_heads
    d = C // H
    tm = _row_tile(Np, C)
    grid = (B, Np // tm, H)          # h innermost: x tile resident across heads

    out_sds = jax.ShapeDtypeStruct((B, H, Np, d), x.dtype)
    out_spec = pl.BlockSpec((1, 1, tm, d), lambda b, i, h: (b, h, i, 0))

    return pl.pallas_call(
        _qkv_kernel,
        out_shape=(out_sds, out_sds, out_sds),
        grid_spec=pltpu.PrefetchScalarGridSpec(
            num_scalar_prefetch=0,
            grid=grid,
            in_specs=[
                pl.BlockSpec((1, tm, C), lambda b, i, h: (b, i, 0)),
                # Row blocks of the (3C, C) weight: q / k / v rows of head h.
                pl.BlockSpec((d, C), lambda b, i, h: (h, 0)),
                pl.BlockSpec((d, C), lambda b, i, h: (H + h, 0)),
                pl.BlockSpec((d, C), lambda b, i, h: (2 * H + h, 0)),
            ],
            out_specs=[out_spec, out_spec, out_spec],
        ),
        compiler_params=pltpu.CompilerParams(
            dimension_semantics=("parallel", "parallel", "parallel"),
            vmem_limit_bytes=_VMEM_LIMIT,
        ),
    )(x, w_qkv, w_qkv, w_qkv)


# ---------------------------------------------------------------------------
# 2) Flash attention: grid (B, H, q_tiles, kv_tiles), online softmax.
# ---------------------------------------------------------------------------
def _flash_kernel(q_ref, k_ref, v_ref, o_ref, m_sc, l_sc, acc_sc,
                  *, scale, n_real, n_pad, tk):
    ki = pl.program_id(3)

    @pl.when(ki == 0)
    def _():
        m_sc[...] = jnp.full_like(m_sc, -jnp.inf)
        l_sc[...] = jnp.zeros_like(l_sc)
        acc_sc[...] = jnp.zeros_like(acc_sc)

    # Softmax scale applied in-kernel on the (tq, d) q tile (VPU has slack);
    # weights stay untouched (no bf16 rounding of the scale into weights).
    q = q_ref[0, 0] * jnp.asarray(scale, dtype=q_ref.dtype)
    k = k_ref[0, 0]
    v = v_ref[0, 0]

    # Scores: contract the last dim of both operands -> no explicit K transpose.
    s = lax.dot_general(q, k, (((1,), (1,)), ((), ())),
                        preferred_element_type=jnp.float32)      # (tq, tk)

    if n_real < n_pad:   # static: only emitted when the sequence was padded
        kv_pos = ki * tk + lax.broadcasted_iota(jnp.int32, (1, tk), 1)
        s = jnp.where(kv_pos < n_real, s, -1e30)

    m_prev = m_sc[...]                                            # (tq, 1)
    m_new = jnp.maximum(m_prev, jnp.max(s, axis=-1, keepdims=True))
    alpha = jnp.exp(m_prev - m_new)

    # bf16 operands -> bf16 exp (packed EUP ~2x on v6e/v7x); f32 path otherwise.
    exp_dtype = jnp.bfloat16 if q_ref.dtype == jnp.bfloat16 else jnp.float32
    p = jnp.exp((s - m_new).astype(exp_dtype))

    l_sc[...] = alpha * l_sc[...] + jnp.sum(
        p.astype(jnp.float32), axis=-1, keepdims=True)
    acc_sc[...] = alpha * acc_sc[...] + jnp.dot(
        p.astype(v.dtype), v, preferred_element_type=jnp.float32)
    m_sc[...] = m_new

    @pl.when(ki == pl.num_programs(3) - 1)
    def _():
        # Exact reciprocal for f32 outputs; EUP approx otherwise (bf16-safe).
        inv_l = pl.reciprocal(l_sc[...], approx=o_ref.dtype != jnp.float32)
        o_ref[0, 0] = (acc_sc[...] * inv_l).astype(o_ref.dtype)


def _flash_attention(q, k, v, *, scale, n_real):
    """q, k, v: (B, H, Np, d). Returns (B, H, Np, d)."""
    B, H, Np, D = q.shape
    tq = _pick_tile(Np, (512, 256, 128, 64, 32, 16, 8))
    tk = _pick_tile(Np, (512, 256, 128, 64, 32, 16, 8))
    grid = (B, H, Np // tq, Np // tk)

    kernel = functools.partial(_flash_kernel, scale=scale, n_real=n_real,
                               n_pad=Np, tk=tk)

    return pl.pallas_call(
        kernel,
        out_shape=jax.ShapeDtypeStruct((B, H, Np, D), q.dtype),
        grid_spec=pltpu.PrefetchScalarGridSpec(
            num_scalar_prefetch=0,
            grid=grid,
            in_specs=[
                pl.BlockSpec((1, 1, tq, D), lambda b, h, qi, ki: (b, h, qi, 0)),
                pl.BlockSpec((1, 1, tk, D), lambda b, h, qi, ki: (b, h, ki, 0)),
                pl.BlockSpec((1, 1, tk, D), lambda b, h, qi, ki: (b, h, ki, 0)),
            ],
            out_specs=pl.BlockSpec((1, 1, tq, D),
                                   lambda b, h, qi, ki: (b, h, qi, 0)),
            scratch_shapes=[
                pltpu.VMEM((tq, 1), jnp.float32),   # m  (running max)
                pltpu.VMEM((tq, 1), jnp.float32),   # l  (running denominator)
                pltpu.VMEM((tq, D), jnp.float32),   # acc (running numerator)
            ],
        ),
        compiler_params=pltpu.CompilerParams(
            dimension_semantics=("parallel", "parallel", "parallel", "arbitrary"),
            vmem_limit_bytes=_VMEM_LIMIT,
        ),
    )(q, k, v)


# ---------------------------------------------------------------------------
# 3) Output projection fused with the head merge (H = reduction grid axis).
# ---------------------------------------------------------------------------
def _proj_kernel(o_ref, w_ref, b_ref, y_ref, acc_ref):
    h = pl.program_id(2)

    @pl.when(h == 0)
    def _():
        acc_ref[...] = jnp.zeros_like(acc_ref)

    # o_h (tm, d) @ W_h^T (d, C), accumulated over heads in f32 VMEM scratch.
    acc_ref[...] += jnp.dot(o_ref[0, 0], w_ref[0],
                            preferred_element_type=jnp.float32)

    @pl.when(h == pl.num_programs(2) - 1)
    def _():
        y_ref[0] = (acc_ref[...] + b_ref[...].astype(jnp.float32)).astype(y_ref.dtype)


def _out_projection(o, w_proj_r, b_proj):
    """o: (B, H, Np, d); w_proj_r: (H, d, C) (= W_proj^T regrouped); b_proj: (1, C).
    Returns (B, Np, C) with a lane-dense (tm, C) output block."""
    B, H, Np, d = o.shape
    C = H * d
    tm = _row_tile(Np, C)
    grid = (B, Np // tm, H)

    return pl.pallas_call(
        _proj_kernel,
        out_shape=jax.ShapeDtypeStruct((B, Np, C), o.dtype),
        grid_spec=pltpu.PrefetchScalarGridSpec(
            num_scalar_prefetch=0,
            grid=grid,
            in_specs=[
                pl.BlockSpec((1, 1, tm, d), lambda b, i, h: (b, h, i, 0)),
                pl.BlockSpec((1, d, C), lambda b, i, h: (h, 0, 0)),
                pl.BlockSpec((1, C), lambda b, i, h: (0, 0)),
            ],
            out_specs=pl.BlockSpec((1, tm, C), lambda b, i, h: (b, i, 0)),
            scratch_shapes=[pltpu.VMEM((tm, C), jnp.float32)],
        ),
        compiler_params=pltpu.CompilerParams(
            dimension_semantics=("parallel", "parallel", "arbitrary"),
            vmem_limit_bytes=_VMEM_LIMIT,
        ),
    )(o, w_proj_r, b_proj)


# ---------------------------------------------------------------------------
# Full Attention forward.
# ---------------------------------------------------------------------------
def attention_pallas(x, w_qkv, w_proj, b_proj, *, num_heads):
    """x: (B, N, C); w_qkv: (3C, C) torch layout; w_proj: (C, C); b_proj: (C,)."""
    B, N, C = x.shape
    assert C % num_heads == 0, "dim must be divisible by num_heads"
    d = C // num_heads
    assert d % 8 == 0, "head_dim must be a multiple of 8 for TPU tiling"
    scale = d ** (-0.5)

    # Pad N to an (8,128)-friendly length; pad keys are masked inside flash.
    Np = _padded_len(N)
    if Np != N:
        x = jnp.pad(x, ((0, 0), (0, Np - N), (0, 0)))

    # 1) QKV projection (no bias), head split done by the output writeback.
    q, k, v = _qkv_project(x, w_qkv, num_heads=num_heads)     # (B, H, Np, d) x3

    # 2) Flash attention (scale applied in-kernel).
    o = _flash_attention(q, k, v, scale=scale, n_real=N)      # (B, H, Np, d)

    # 3) Output projection + head merge. The only weight reshuffle in the whole
    #    forward: W_proj^T regrouped per head (one-off (C, C) op, negligible
    #    next to activation traffic).
    w_proj_r = jnp.transpose(w_proj).reshape(num_heads, d, C)
    y = _out_projection(o, w_proj_r, b_proj.reshape(1, C))    # (B, Np, C)

    return y[:, :N, :] if Np != N else y


def attention_ref(x, w_qkv, w_proj, b_proj, *, num_heads):
    """Pure-JAX reference mirroring the PyTorch forward (dropout = identity)."""
    B, N, C = x.shape
    d = C // num_heads
    scale = d ** (-0.5)
    qkv = jnp.einsum('bnc,oc->bno', x, w_qkv)
    q, k, v = jnp.split(qkv, 3, axis=-1)

    def to_heads(t):
        return jnp.transpose(t.reshape(B, N, num_heads, d), (0, 2, 1, 3))

    q, k, v = map(to_heads, (q, k, v))
    q = q * scale
    attn = jax.nn.softmax(jnp.einsum('bhid,bhjd->bhij', q, k), axis=-1)
    out = jnp.einsum('bhij,bhjd->bhid', attn, v)
    out = jnp.transpose(out, (0, 2, 1, 3)).reshape(B, N, C)
    return jnp.einsum('bnc,oc->bno', out, w_proj) + b_proj


if __name__ == "__main__":
    num_heads = 4
    configs = [
        (2, 16, 64),   # aligned sequence (no padding path)
        (1, 12, 64),   # N not a multiple of 8 -> exercises padding + key masking
    ]
    key = jax.random.PRNGKey(0)
    for (B, N, C) in configs:
        key, k_x, k_wqkv, k_wproj, k_bproj = jax.random.split(key, 5)
        x = jax.random.normal(k_x, (B, N, C), dtype=jnp.float32)
        w_qkv = jax.random.normal(k_wqkv, (3 * C, C), dtype=jnp.float32) * 0.05
        w_proj = jax.random.normal(k_wproj, (C, C), dtype=jnp.float32) * 0.05
        b_proj = jax.random.normal(k_bproj, (C,), dtype=jnp.float32) * 0.05

        out = attention_pallas(x, w_qkv, w_proj, b_proj, num_heads=num_heads)
        out = jax.block_until_ready(out)

        ref = attention_ref(x, w_qkv, w_proj, b_proj, num_heads=num_heads)
        assert out.shape == (B, N, C)
        max_err = float(jnp.max(jnp.abs(out - ref)))
        assert jnp.allclose(out, ref, atol=2e-3, rtol=2e-3), (
            f"mismatch vs reference at {(B, N, C)} (max abs err {max_err})")

    print("KERNEL_OK")
</pallas_src>

<mosaic_0001>
module attributes {stable_mosaic.version = 11 : i64} {
  func.func @_qkv_kernel(%arg0: i32, %arg1: i32, %arg2: i32, %arg3: memref<1x16x64xf32, #tpu.memory_space<vmem>>, %arg4: memref<16x64xf32, #tpu.memory_space<vmem>>, %arg5: memref<16x64xf32, #tpu.memory_space<vmem>>, %arg6: memref<16x64xf32, #tpu.memory_space<vmem>>, %arg7: memref<1x1x16x16xf32, #tpu.memory_space<vmem>>, %arg8: memref<1x1x16x16xf32, #tpu.memory_space<vmem>>, %arg9: memref<1x1x16x16xf32, #tpu.memory_space<vmem>>) attributes {dimension_semantics = [#tpu.dimension_semantics<parallel>, #tpu.dimension_semantics<parallel>, #tpu.dimension_semantics<parallel>], iteration_bounds = array<i64: 2, 1, 4>, scalar_prefetch = 0 : i64, scratch_operands = 0 : i64, tpu.core_type = #tpu.core_type<tc>, window_params = [{transform_indices = @transform_0, window_bounds = array<i64: 1, 16, 64>}, {transform_indices = @transform_1, window_bounds = array<i64: 16, 64>}, {transform_indices = @transform_2, window_bounds = array<i64: 16, 64>}, {transform_indices = @transform_3, window_bounds = array<i64: 16, 64>}, {transform_indices = @transform_4, window_bounds = array<i64: 1, 1, 16, 16>}, {transform_indices = @transform_5, window_bounds = array<i64: 1, 1, 16, 16>}, {transform_indices = @transform_6, window_bounds = array<i64: 1, 1, 16, 16>}]} {
    %c0 = arith.constant 0 : index
    %c0_0 = arith.constant 0 : index
    %c0_1 = arith.constant 0 : index
    %0 = vector.load %arg3[%c0, %c0_0, %c0_1] : memref<1x16x64xf32, #tpu.memory_space<vmem>>, vector<1x16x64xf32>
    %1 = vector.shape_cast %0 : vector<1x16x64xf32> to vector<16x64xf32>
    %c0_2 = arith.constant 0 : index
    %c0_3 = arith.constant 0 : index
    %2 = vector.load %arg4[%c0_2, %c0_3] : memref<16x64xf32, #tpu.memory_space<vmem>>, vector<16x64xf32>
    %cst = arith.constant dense<0.000000e+00> : vector<16x16xf32>
    %3 = tpu.matmul %1, %2, %cst {dimension_numbers = #tpu.dot_dimension_numbers<[1], [1], [0], [0], [0, 0, 1, 0], [], []>} : vector<16x64xf32>, vector<16x64xf32>, vector<16x16xf32> -> vector<16x16xf32>
    %c0_4 = arith.constant 0 : index
    %c0_5 = arith.constant 0 : index
    %c0_6 = arith.constant 0 : index
    %c0_7 = arith.constant 0 : index
    %4 = vector.load %arg7[%c0_4, %c0_5, %c0_6, %c0_7] : memref<1x1x16x16xf32, #tpu.memory_space<vmem>>, vector<1x1x16x16xf32>
    %5 = vector.shape_cast %4 : vector<1x1x16x16xf32> to vector<16x16xf32>
    %6 = vector.shape_cast %3 : vector<16x16xf32> to vector<1x1x16x16xf32>
    tpu.vector_store %arg7[%c0_4, %c0_5, %c0_6, %c0_7], %6 {strides = array<i32>} : memref<1x1x16x16xf32, #tpu.memory_space<vmem>>, vector<1x1x16x16xf32>,
    %c0_8 = arith.constant 0 : index
    %c0_9 = arith.constant 0 : index
    %7 = vector.load %arg5[%c0_8, %c0_9] : memref<16x64xf32, #tpu.memory_space<vmem>>, vector<16x64xf32>
    %cst_10 = arith.constant dense<0.000000e+00> : vector<16x16xf32>
    %8 = tpu.matmul %1, %7, %cst_10 {dimension_numbers = #tpu.dot_dimension_numbers<[1], [1], [0], [0], [0, 0, 1, 0], [], []>} : vector<16x64xf32>, vector<16x64xf32>, vector<16x16xf32> -> vector<16x16xf32>
    %c0_11 = arith.constant 0 : index
    %c0_12 = arith.constant 0 : index
    %c0_13 = arith.constant 0 : index
    %c0_14 = arith.constant 0 : index
    %9 = vector.load %arg8[%c0_11, %c0_12, %c0_13, %c0_14] : memref<1x1x16x16xf32, #tpu.memory_space<vmem>>, vector<1x1x16x16xf32>
    %10 = vector.shape_cast %9 : vector<1x1x16x16xf32> to vector<16x16xf32>
    %11 = vector.shape_cast %8 : vector<16x16xf32> to vector<1x1x16x16xf32>
    tpu.vector_store %arg8[%c0_11, %c0_12, %c0_13, %c0_14], %11 {strides = array<i32>} : memref<1x1x16x16xf32, #tpu.memory_space<vmem>>, vector<1x1x16x16xf32>,
    %c0_15 = arith.constant 0 : index
    %c0_16 = arith.constant 0 : index
    %12 = vector.load %arg6[%c0_15, %c0_16] : memref<16x64xf32, #tpu.memory_space<vmem>>, vector<16x64xf32>
    %cst_17 = arith.constant dense<0.000000e+00> : vector<16x16xf32>
    %13 = tpu.matmul %1, %12, %cst_17 {dimension_numbers = #tpu.dot_dimension_numbers<[1], [1], [0], [0], [0, 0, 1, 0], [], []>} : vector<16x64xf32>, vector<16x64xf32>, vector<16x16xf32> -> vector<16x16xf32>
    %c0_18 = arith.constant 0 : index
    %c0_19 = arith.constant 0 : index
    %c0_20 = arith.constant 0 : index
    %c0_21 = arith.constant 0 : index
    %14 = vector.load %arg9[%c0_18, %c0_19, %c0_20, %c0_21] : memref<1x1x16x16xf32, #tpu.memory_space<vmem>>, vector<1x1x16x16xf32>
    %15 = vector.shape_cast %14 : vector<1x1x16x16xf32> to vector<16x16xf32>
    %16 = vector.shape_cast %13 : vector<16x16xf32> to vector<1x1x16x16xf32>
    tpu.vector_store %arg9[%c0_18, %c0_19, %c0_20, %c0_21], %16 {strides = array<i32>} : memref<1x1x16x16xf32, #tpu.memory_space<vmem>>, vector<1x1x16x16xf32>,
    return
  }
  func.func @transform_0(%arg0: i32, %arg1: i32, %arg2: i32) -> (i32, i32, i32) {
    %c0_i32 = arith.constant 0 : i32
    %c0_i32_0 = arith.constant 0 : i32
    return %arg0, %arg1, %c0_i32 : i32, i32, i32
  }
  func.func @transform_1(%arg0: i32, %arg1: i32, %arg2: i32) -> (i32, i32) {
    %c0_i32 = arith.constant 0 : i32
    %c0_i32_0 = arith.constant 0 : i32
    return %arg2, %c0_i32 : i32, i32
  }
  func.func @transform_2(%arg0: i32, %arg1: i32, %arg2: i32) -> (i32, i32) {
    %c4_i32 = arith.constant 4 : i32
    %0 = arith.addi %c4_i32, %arg2 : i32
    %c0_i32 = arith.constant 0 : i32
    %c0_i32_0 = arith.constant 0 : i32
    return %0, %c0_i32 : i32, i32
  }
  func.func @transform_3(%arg0: i32, %arg1: i32, %arg2: i32) -> (i32, i32) {
    %c8_i32 = arith.constant 8 : i32
    %0 = arith.addi %c8_i32, %arg2 : i32
    %c0_i32 = arith.constant 0 : i32
    %c0_i32_0 = arith.constant 0 : i32
    return %0, %c0_i32 : i32, i32
  }
  func.func @transform_4(%arg0: i32, %arg1: i32, %arg2: i32) -> (i32, i32, i32, i32) {
    %c0_i32 = arith.constant 0 : i32
    %c0_i32_0 = arith.constant 0 : i32
    return %arg0, %arg2, %arg1, %c0_i32 : i32, i32, i32, i32
  }
  func.func @transform_5(%arg0: i32, %arg1: i32, %arg2: i32) -> (i32, i32, i32, i32) {
    %c0_i32 = arith.constant 0 : i32
    %c0_i32_0 = arith.constant 0 : i32
    return %arg0, %arg2, %arg1, %c0_i32 : i32, i32, i32, i32
  }
  func.func @transform_6(%arg0: i32, %arg1: i32, %arg2: i32) -> (i32, i32, i32, i32) {
    %c0_i32 = arith.constant 0 : i32
    %c0_i32_0 = arith.constant 0 : i32
    return %arg0, %arg2, %arg1, %c0_i32 : i32, i32, i32, i32
  }
}

</mosaic_0001>

<bundles_post_ra>
// kernel: tpu_custom_call.1
= control target key start
LH: loop header
LB: loop body
LE: loop exit
PB: predicated region body
PF: predicated region fallthrough
CT: control target
= control target key end

     0   :  { %s1334_s0 = inlined_call_operand.vmem [shape: f32[2,16,64], index: 0, kind: input, shape index: {}]   ;;  %s1335_s1 = inlined_call_operand.vmem [shape: f32[192,64], index: 1, kind: input, shape index: {}]   ;;  %s1336_s2 = inlined_call_operand.vmem [shape: f32[192,64], index: 2, kind: input, shape index: {}]   ;;  %s1337_s3 = inlined_call_operand.vmem [shape: f32[192,64], index: 3, kind: input, shape index: {}]   ;;  %s1338_s4 = inlined_call_operand.hbm [shape: f32[2,4,16,16], index: 4, kind: output, shape index: {0}]   ;;  %s1339_s5 = inlined_call_operand.hbm [shape: f32[2,4,16,16], index: 5, kind: output, shape index: {1}]   ;;  %s1340_s6 = inlined_call_operand.hbm [shape: f32[2,4,16,16], index: 6, kind: output, shape index: {2}]  }
   0x1   :  { %1347 = sst [smem:[#allocation12_spill]] %s1334_s0 }
   0x2   :  { %1348 = sst [smem:[#allocation13_spill]] %s1335_s1 }
   0x3   :  { %1349 = sst [smem:[#allocation14_spill]] %s1336_s2 }
   0x4   :  { %1350 = sst [smem:[#allocation15_spill]] %s1337_s3 }
   0x5   :  { %12 = vsyncpa [#allocation3], 0 }
   0x6   :  { %14 = vsyncpa [#allocation3 + $0x1], 0 }
   0x7   :  { %15 = vsyncpa [#allocation5], 0 }
   0x8   :  { %17 = vsyncpa [#allocation5 + $0x1], 0  ;;  %s1100_s21 = smov 0   ;;  %s1102_s22 = smov 0  }
   0x9   :  { %s1104_s23 = smov 0   ;;  %s1106_s24 = smov 0  }
   0xa   :  { %s1108_s25 = smov 0   ;;  %s1110_s26 = smov 0  }
   0xb   :  { %s1112_s27 = smov 0   ;;  %s1114_s28 = smov 0  }
   0xc LB: > { %1351 = sst [smem:[#allocation9_spill]] %s1057_s27  ;;  %s1342_s29 = sadd.s32 4294967295, %s1061_s28   ;;  %s1061_s28 = sphi %s1114_s28, %s23_s28   ;;  %s1057_s27 = sphi %s1112_s27, %s1365_s27   ;;  %s1053_s26 = sphi %s1110_s26, %s1370_s26   ;;  %s1049_s25 = sphi %s1108_s25, %s1363_s25   ;;  %s1045_s24 = sphi %s1106_s24, %s1369_s24   ;;  %s1041_s23 = sphi %s1104_s23, %s1368_s23   ;;  %s1037_s22 = sphi %s1102_s22, %s1367_s22   ;;  %s1033_s21 = sphi %s1100_s21, %s1366_s21  }
   0xd   : > { %s1341_s30 = sadd.s32 4294967294, %s1061_s28   ;;  %s35_s7 = sadd.s32 1, %s1053_s26 }
   0xe   : > { %p36_p0 = scmp.ge.s32.totalorder %s35_s7, 4  ;;  %s42_s8 = sadd.s32 1, %s1057_s27 }
   0xf   : > { %p173_p1 = scmp.ne.s32.totalorder %s1041_s23, %s1037_s22  ;;  %p174_p2 = scmp.eq.s32.totalorder %s1342_s29, 7 }
  0x10   : > { %s1372_s7 = smov (%p36_p0, %s35_s7), 0  ;;  %s1374_s8 = smov (!%p36_p0, %s42_s8), %s1057_s27 }
  0x11   : > { %1352 = sst [smem:[#allocation10_spill]] %s1372_s7  ;;  %s157_s9 = ssub.s32 %s1053_s26, %s1372_s7 }
  0x12   : > { %p1153_p3 = por %p174_p2, %p173_p1  ;;  %p44_p4 = scmp.ge.s32.totalorder %s1374_s8, 2 }
  0x13   : > { %p179_p5 = scmp.ne.s32.totalorder %s1037_s22, %s1033_s21  ;;  %p180_p6 = scmp.eq.s32.totalorder %s1341_s30, 7 }
  0x14   : > { %p779_p7 = scmp.ge.s32.totalorder %s1061_s28, 1  ;;  %s1376_s8 = smov (%p44_p4, %s1374_s8), 0 }
  0x15   : > { %1354 = sst [smem:[#allocation11_spill]] %s1376_s8  ;;  %p1164_p8 = por %p180_p6, %p179_p5 }
  0x16   : > { %p302_p9 = scmp.lt.s32.totalorder %s1061_s28, 9  ;;  %s156_s12 = ssub.s32 %s1057_s27, %s1376_s8 }
  0x17   : > { %s163_s13 = sadd.s32 1, %s1041_s23  ;;  %s158_s14 = sor.u32 %s157_s9, %s156_s12 }
  0x18   : > { %p303_p10 = pnand %p779_p7, %p302_p9  ;;  %p161_p11 = scmp.eq.s32.totalorder %s158_s14, 0 }
  0x19   : > { %s1176_s16 = sshll.u32 (!%p303_p10), %s1045_s24, 1  ;;  %p364_p12 = scmp.lt.s32.totalorder (!%p303_p10), %s1049_s25, 1 }
  0x1a   : > { %s1173_s15 = scalar_select %p161_p11, %s1041_s23, %s163_s13  }
  0x1b   : > { %306 = sbr.rel (%p303_p10) target bundleno = 207 (0xcf), region = 36  ;;  %s821_s17 = sadd.s32 (!%p303_p10), 16, %s1176_s16 }
  0x1c   : > { %s819_s18 = sadd.s32 (!%p303_p10), 8, %s1176_s16  ;;  %p389_p13 = scmp.lt.s32.totalorder (!%p303_p10), %s821_s17, 23 }
  0x1d   : > { %p381_p0 = scmp.lt.s32.totalorder (!%p303_p10), %s819_s18, 23  ;;  %s1356_s3 = sld [smem:[#allocation15_spill]] (!%p303_p10) }
  0x1e   : > { %s1357_s2 = sld [smem:[#allocation14_spill]] (!%p303_p10)  ;;  %p374_p1 = scmp.lt.s32.totalorder (!%p303_p10), %s1176_s16, 23 }
  0x1f   : > { %s1358_s0 = sld [smem:[#allocation12_spill]] (!%p303_p10)  ;;  %s807_s7 = sshll.u32 (!%p303_p10), %s1049_s25, 3 }
  0x20   : > { %s365_s19 = scalar_select %p364_p12, %s1049_s25, 1  ;;  %vm402_vm0 = vcmask 523264   ;;  %vm438_vm1 = vcmask 130048  }
  0x21   : > { %s1378_s17 = smov (!%p389_p13, %s821_s17), 23  ;;  %s1380_s18 = smov (!%p381_p0, %s819_s18), 23 }
  0x22   : > { %s790_s20 = sshll.u32 %s1378_s17, 3  ;;  %s817_s9 = sshll.u32 %s365_s19, 4 }
  0x23   : > { %s392_s24 = scalar_lea.vmem %s1356_s3, %s790_s20  ;;  %s788_s14 = sshll.u32 %s1380_s18, 3 }
  0x24   : > { %v475_v0 = vld [vmem:[%s392_s24 + $0x8] sm:$0xff]  ;;  %s384_s8 = scalar_lea.vmem %s1357_s2, %s788_s14  ;;  %v474_v2 = vld [vmem:[%s392_s24] sm:$0xff]  ;;  %s1359_s1 = sld [smem:[#allocation13_spill]] }
  0x25   : > { %799 = vmatpush.xpose.msk.msra.mxu2 %vm402_vm0, %v475_v0  ;;  %v442_v1 = vld [vmem:[%s384_s8 + $0x8] sm:$0xff]  ;;  %s371_s19 = scalar_lea.vmem %s1358_s0, %s817_s9  ;;  %v441_v3 = vld [vmem:[%s384_s8] sm:$0xff]  ;;  %s531_s9 = sadd.s32 %s807_s7, %s1176_s16 }
  0x26   : > { %795 = vmatpush.xpose.msk.msra.mxu1 %vm402_vm0, %v442_v1  ;;  %s375_s27 = scalar_select %p374_p1, %s1176_s16, 23  ;;  %v398_v4 = vld [vmem:[%s371_s19] sm:$0xff]  ;;  %v399_v7 = vld [vmem:[%s371_s19 + $0x8] sm:$0xff] }
  0x27   : > { %s808_s12 = sshll.u32 %s531_s9, 3 }
  0x28   : > { %s786_s18 = sshll.u32 %s375_s27, 3  ;;  %s1346_s27 = sand.u32 1, %s1037_s22  }
  0x29   : > { %800 = vmatpush.xpose.msk.msra.mxu2 %vm402_vm0, %v474_v2  ;;  %s780_s8 = sshll.u32 %s1346_s27, 4  ;;  %s554_s19 = scalar_lea.hbm %s1339_s5, %s808_s12 }
  0x2a   : > { %s377_s30 = scalar_lea.vmem %s1359_s1, %s786_s18  ;;  %796 = vmatpush.xpose.msk.msra.mxu1 %vm402_vm0, %v441_v3  ;;  %s355_s13 = scalar_lea.vmem [#allocation4], %s780_s8 }
  0x2b   : > { %v401_v5 = vld [vmem:[%s377_s30 + $0x8] sm:$0xff]  ;;  %v400_v6 = vld [vmem:[%s377_s30] sm:$0xff]  ;;  %s555_s24 = sshll.u32 %s355_s13, 4  ;;  %s1360_s18 = sadd.s32 4294967295, %s1061_s28   ;;  %s1223_s24 = int_to_ptr.vmem [resolvable:$true] %s555_s24 }
  0x2c   : > { %801 = vmatmul.msk.f32.vlgmr.msra.gmra.mxu2 %vm402_vm0, %v398_v4  ;;  %822 = vmatpush.xpose.msk.msra.mxu3 %vm402_vm0, %v401_v5  ;;  %s1221_s20 = sand.u32 1, %s1360_s18   ;;  %s1225_s25 = sshll.u32 %s554_s19, 4  ;;  %s558_s25 = int_to_ptr.hbm [resolvable:$true] %s1225_s25 }
  0x2d   : > { %797 = vmatmul.msk.f32.vlgmr.msra.gmra.mxu1 %vm402_vm0, %v398_v4  ;;  %791 = vmatpush.xpose.msk.msra.mxu0 %vm402_vm0, %v401_v5  ;;  %s1227_s16 = scalar_lea.vmem [#allocation6], %s780_s8  ;;  %s533_s7 = scalar_lea.hbm %s1338_s4, %s808_s12 }
  0x2e   : > { %s575_s17 = scalar_lea.hbm %s1340_s6, %s808_s12  ;;  %s576_s19 = sshll.u32 %s1227_s16, 4  ;;  %s1263_s19 = int_to_ptr.vmem [resolvable:$true] %s576_s19 }
  0x2f   : > { %s348_s18 = scalar_lea.vmem [#allocation2], %s780_s8  ;;  %s1241_s0 = sshll.u32 %s533_s7, 4  ;;  %s537_s0 = int_to_ptr.hbm [resolvable:$true] %s1241_s0 }
  0x30   : > { %823 = vmatpush.xpose.msk.msra.mxu3 %vm402_vm0, %v400_v6  ;;  %s534_s27 = sshll.u32 %s348_s18, 4  ;;  %s1243_s1 = sshll.u32 %s575_s17, 4  ;;  %s535_s27 = int_to_ptr.vmem [resolvable:$true] %s534_s27  ;;  %s579_s1 = int_to_ptr.hbm [resolvable:$true] %s1243_s1 }
  0x31   : > { %792 = vmatpush.xpose.msk.msra.mxu0 %vm402_vm0, %v400_v6  ;;  %s513_s29 = scalar_lea.sflag [#allocation5], %s1221_s20  ;;  %s921_s30 = sshra.s32 %s558_s25, 4  ;;  %s922_s30 = int_to_ptr.hbm [resolvable:$true] %s921_s30 }
  0x32   : > { %s923_s9 = scalar_lea.hbm %s922_s30, 16  ;;  %s927_s8 = scalar_lea.hbm %s1339_s5, 128 }
  0x33   : > { %794 = vmatmul.msk.f32.vlgmr.msra.gmra.mxu3 %vm402_vm0, %v399_v7  ;;  %p924_p2 = scmp.ne.s32.totalorder %s922_s30, %s923_s9  ;;  %p928_p6 = scmp.lt.s32.totalorder %s922_s30, %s1339_s5 }
  0x34   : > { %802 = vmatmul.msk.f32.gmra.mxu2 %vm402_vm0, %v399_v7  ;;  %793 = vmatmul.msk.f32.vlgmr.msra.gmra.mxu0 %vm402_vm0, %v398_v4  ;;  %p929_p7 = scmp.lt.s32.totalorder %s927_s8, %s923_s9 }
  0x35   : > { %798 = vmatmul.msk.f32.gmra.mxu1 %vm402_vm0, %v399_v7  ;;  %p925_p4 = pnand %p924_p2, %p1153_p3 }
  0x36   : > { %p930_p9 = por %p929_p7, %p928_p6 }
  0x37   : > { %p926_p5 = pneg %p925_p4 }
  0x39   : > { %p931_p10 = pnand %p930_p9, %p926_p5 }
  0xaa   : > { %v466_v8 = vpop.f32.mrf.mxu1 }
  0xab   : > { %472 = vst.msk [vmem:[%s355_s13] sm:$0xff] %vm438_vm1, %v466_v8 }
  0xaf   : > { %v499_v9 = vpop.f32.mrf.mxu2 }
  0xb0   : > { %505 = vst.msk [vmem:[%s1227_s16] sm:$0xff] %vm438_vm1, %v499_v9 }
  0xb1   : > { %v432_v10 = vpop.f32.mrf.mxu0 }
  0xb2   : > { %v469_v11 = vpop.f32.mrf.mxu1  ;;  %439 = vst.msk [vmem:[%s348_s18] sm:$0xff] %vm438_vm1, %v432_v10 }
  0xb3   : > { %473 = vst.msk [vmem:[%s355_s13 + $0x8] sm:$0xff] %vm438_vm1, %v469_v11 }
  0xb4   : > { %934 = shalt.err (!%p931_p10)
}
  0xb5   : > { %s1063_s13 = smov 128   ;;  %s1064_s7 = smov 8  }
  0xb6   : > { %825 = dma.vmem_to_hbm [thread:$0]  (%p1153_p3), %s1223_s24, 256, %s558_s25, %s513_s29, %s1063_s13, %s1063_s13, %s1064_s7   ;;  %v435_v12 = vpop.f32.mrf.mxu3 }
  0xb7   : > { %440 = vst.msk [vmem:[%s348_s18 + $0x8] sm:$0xff] %vm438_vm1, %v435_v12  ;;  %v502_v13 = vpop.f32.mrf.mxu2  ;;  %s1361_s2 = sand.u32 1, %s1037_s22   ;;  %s949_s17 = sshra.s32 %s537_s0, 4  ;;  %s950_s17 = int_to_ptr.hbm [resolvable:$true] %s949_s17 }
  0xb8   : > { %506 = vst.msk [vmem:[%s1227_s16 + $0x8] sm:$0xff] %vm438_vm1, %v502_v13  ;;  %s508_s3 = scalar_lea.sflag [#allocation3], %s1361_s2  ;;  %s951_s30 = scalar_lea.hbm %s950_s17, 16 }
  0xb9   : > { %p952_p11 = scmp.ne.s32.totalorder %s950_s17, %s951_s30  ;;  %s955_s9 = scalar_lea.hbm %s1338_s4, 128 }
  0xba   : > { %p956_p0 = scmp.lt.s32.totalorder %s950_s17, %s1338_s4  ;;  %p957_p1 = scmp.lt.s32.totalorder %s955_s9, %s951_s30 }
  0xbb   : > { %p953_p12 = pnand %p952_p11, %p1153_p3 }
  0xbc   : > { %p958_p2 = por %p957_p1, %p956_p0 }
  0xbd   : > { %p954_p13 = pneg %p953_p12 }
  0xbf   : > { %p959_p4 = pnand %p958_p2, %p954_p13 }
  0xc1   : > { %962 = shalt.err (!%p959_p4)
}
  0xc2   : > { %824 = dma.vmem_to_hbm [thread:$0]  (%p1153_p3), %s535_s27, 256, %s537_s0, %s508_s3, %s1063_s13, %s1063_s13, %s1064_s7  }
  0xc3   : > { %s977_s16 = sshra.s32 %s579_s1, 4  ;;  %s983_s17 = scalar_lea.hbm %s1340_s6, 128  ;;  %s978_s16 = int_to_ptr.hbm [resolvable:$true] %s977_s16 }
  0xc4   : > { %s979_s18 = scalar_lea.hbm %s978_s16, 16  ;;  %p984_p9 = scmp.lt.s32.totalorder %s978_s16, %s1340_s6 }
  0xc5   : > { %p980_p5 = scmp.ne.s32.totalorder %s978_s16, %s979_s18  ;;  %p985_p10 = scmp.lt.s32.totalorder %s983_s17, %s979_s18 }
  0xc7   : > { %p981_p6 = pnand %p980_p5, %p1153_p3  ;;  %p986_p11 = por %p985_p10, %p984_p9 }
  0xc9   : > { %p982_p7 = pneg %p981_p6 }
  0xcb   : > { %p987_p12 = pnand %p986_p11, %p982_p7 }
  0xcd   : > { %990 = shalt.err (!%p987_p12)
}
  0xce   : > { %826 = dma.vmem_to_hbm [thread:$0]  (%p1153_p3), %s1263_s19, 256, %s579_s1, %s513_s29, %s1063_s13, %s1063_s13, %s1064_s7  }
  0xcf PF: > { %p840_p13 = scmp.ge.s32.totalorder %s1061_s28, 2  ;;  %s593_s0 = sand.u32 1, %s1033_s21  }
  0xd0   : > { %s594_s27 = scalar_lea.sflag [#allocation3], %s593_s0 }
  0xd1   : > { %p831_p0 = pnand %p840_p13, %p1164_p8 }
  0xd3   : > { %p832_p1 = pneg %p831_p0 }
  0xd5   : > { %1024 = dma.done.wait (%p832_p1), %s594_s27, 256  }
  0xd6   : > { %1026 = vsyncadd (%p832_p1), %s594_s27, 4294967040  ;;  %s1362_s10 = sadd.s32 4294967294, %s1061_s28  }
  0xd7   : > { %s603_s3 = sand.u32 1, %s1362_s10  }
  0xd8   : > { %s604_s20 = scalar_lea.sflag [#allocation5], %s603_s3 }
  0xd9   : > { %1028 = dma.done.wait (%p832_p1), %s604_s20, 512  }
  0xda   : > { %1030 = vsyncadd (%p832_p1), %s604_s20, 4294966784  ;;  %s23_s28 = sadd.s32 1, %s1061_s28   ;;  %s1363_s25 = sld [smem:[#allocation9_spill]] }
  0xdb   : > { %p20_p3 = scmp.ge.s32.totalorder %s23_s28, 10   ;;  %s1364_s1 = sld [smem:[#allocation10_spill]] }
  0xdc   : > { %s1365_s27 = sld [smem:[#allocation11_spill]]  ;;  %s1366_s21 = smov %s1037_s22 }
  0xdd   : > { %s1367_s22 = smov %s1041_s23  ;;  %s1368_s23 = smov %s1173_s15 }
  0xde   : > { %s1369_s24 = smov %s1053_s26  ;;  %22 = sbr.rel (!%p20_p3) target bundleno = 12 (0xc), region = 112 }
  0xe1   : > { %s1370_s26 = smov %s1364_s1 }
  0xe3   :  { %620 = vsyncpa [#allocation3], 1 }
  0xe4   :  { %622 = vsyncpa [#allocation3 + $0x1], 1 }
  0xe5   :  { %623 = vsyncpa [#allocation5], 1 }
  0xe6   :  { %625 = vsyncpa [#allocation5 + $0x1], 1 }

</bundles_post_ra>
